<compile_context>
chip_gen: v7x
topology: tpu7x:2x2x1
jax: 0.10.0
libtpu: 0.0.40
codegen_flags: <defaults>
</compile_context>

<pallas_src>
import functools
import math

import jax
import jax.numpy as jnp
import numpy as np
from jax.experimental import pallas as pl
from jax.experimental.pallas import tpu as pltpu


def scale_module_kernel(x_ref, scale_ref, offset_ref, out_ref,
                        *, negative_slope: float):
    # One fused VPU expression per (tn, tc) tile.
    x = x_ref[...].astype(jnp.float32)                  # native-dtype stream
    z = x * scale_ref[...] + offset_ref[...]            # folded affine
    y = jnp.maximum(z, jnp.float32(negative_slope) * z)  # leaky_relu, 0<=slope<=1
    out_ref[...] = y.astype(out_ref.dtype)


def _choose_layout(N, D):
    """Return (R, L, k) so the data can be viewed lane-dense as (R, L=k*D)."""
    if D % 128 == 0:
        return N, D, 1
    k0 = 128 // math.gcd(D, 128)        # smallest k with (k*D) % 128 == 0
    if N % k0 == 0:
        return N // k0, k0 * D, k0
    # Fallback: keep (N, D); correct but uses masked (partial-lane) stores.
    return N, D, 1


def _choose_tiles(R, L, itemsize_bytes, target_bytes=2 << 20):
    """Pick (tn, tc) so a block is ~target_bytes and (8,128)-aligned."""
    # Column tile (lane axis): full row unless even 8 rows blow the budget.
    if L % 128 != 0 or 8 * L * itemsize_bytes <= target_bytes:
        tc = L
    else:
        tc = (target_bytes // (8 * itemsize_bytes)) // 128 * 128
        tc = int(min(max(tc, 128), L))
    # Row tile (sublane axis): fill the byte budget, multiple of 8.
    tn = (target_bytes // (tc * itemsize_bytes)) // 8 * 8
    tn = int(max(tn, 8))
    if R >= 16:
        # Keep >=2 grid steps along rows so the "parallel" axis can shard
        # across v7x's two TensorCores (no-op on v5e/v6e).
        half = -(-R // 2)
        half = -(-half // 8) * 8
        tn = min(tn, half)
    if tn >= R:
        tn = R
    return tn, tc


def scale_module(semantic_vec, field_center, scale, bias,
                 *, negative_slope: float = 0.1):
    """semantic_vec: (..., D); field_center: (D,);
    scale/bias: (1,) for xdim==1 or (1, D) for xdim==2 (PyTorch layouts)."""
    orig_shape = semantic_vec.shape
    D = orig_shape[-1]
    N = int(np.prod(orig_shape[:-1])) if len(orig_shape) > 1 else 1
    in_dtype = semantic_vec.dtype
    x = semantic_vec.reshape(N, D)

    # Fold the affine once in the wrapper (tiny (1, D) computation):
    #   (x - c) * s + b  ==  x * s + (b - c * s)
    center = jnp.asarray(field_center, jnp.float32).reshape(1, -1)       # (1, D)
    scale_f = jnp.broadcast_to(
        jnp.asarray(scale, jnp.float32).reshape(1, -1), (1, D))
    bias_f = jnp.broadcast_to(
        jnp.asarray(bias, jnp.float32).reshape(1, -1), (1, D))
    offset_f = bias_f - center * scale_f                                 # (1, D)

    # Lane-dense view: (N, D) -> (R, L) with L a multiple of 128 when possible.
    R, L, k = _choose_layout(N, D)
    x2 = x.reshape(R, L)                      # free view of contiguous data
    if k > 1:
        scale_f = jnp.tile(scale_f, (1, k))   # (1, L)
        offset_f = jnp.tile(offset_f, (1, k))

    # Byte-budget tiles (~2 MiB f32-equivalent per block).
    work_itemsize = max(jnp.dtype(in_dtype).itemsize, 4)
    tn, tc = _choose_tiles(R, L, work_itemsize)
    grid = (pl.cdiv(R, tn), pl.cdiv(L, tc))

    row_spec = pl.BlockSpec((tn, tc), lambda i, j: (i, j))
    param_spec = pl.BlockSpec((1, tc), lambda i, j: (0, j))

    out = pl.pallas_call(
        functools.partial(scale_module_kernel, negative_slope=negative_slope),
        out_shape=jax.ShapeDtypeStruct((R, L), in_dtype),
        grid=grid,
        in_specs=[row_spec, param_spec, param_spec],
        out_specs=row_spec,
        compiler_params=pltpu.CompilerParams(
            dimension_semantics=("parallel", "parallel"),
            vmem_limit_bytes=32 * 1024 * 1024),
    )(x2, scale_f, offset_f)

    return out.reshape(orig_shape)


def scale_module_ref(semantic_vec, field_center, scale, bias,
                     *, negative_slope: float = 0.1):
    """Pure-JAX reference mirroring the PyTorch forward (unfolded affine)."""
    z = (semantic_vec - field_center) * scale + bias
    return jnp.where(z >= 0, z, negative_slope * z)


if __name__ == "__main__":
    # Small deterministic shapes consistent with the module's forward.
    N, D = 8, 32

    key = jax.random.PRNGKey(0)
    k1, k2, k3, k4, k5, k6 = jax.random.split(key, 6)
    semantic_vec = jax.random.normal(k1, (N, D), dtype=jnp.float32)
    field_center = jax.random.normal(k2, (D,), dtype=jnp.float32)

    # xdim == 2: scale/bias are (1, D)
    scale2 = 1.0 + 0.1 * jax.random.normal(k3, (1, D), dtype=jnp.float32)
    bias2 = 0.1 * jax.random.normal(k4, (1, D), dtype=jnp.float32)
    out2 = jax.block_until_ready(
        scale_module(semantic_vec, field_center, scale2, bias2))
    ref2 = scale_module_ref(semantic_vec, field_center, scale2, bias2)
    np.testing.assert_allclose(np.asarray(out2), np.asarray(ref2),
                               rtol=1e-5, atol=1e-5)

    # xdim == 1: scale/bias are scalar (shape (1,))
    scale1 = 1.0 + 0.1 * jax.random.normal(k5, (1,), dtype=jnp.float32)
    bias1 = 0.1 * jax.random.normal(k6, (1,), dtype=jnp.float32)
    out1 = jax.block_until_ready(
        scale_module(semantic_vec, field_center, scale1, bias1))
    ref1 = scale_module_ref(semantic_vec, field_center, scale1, bias1)
    np.testing.assert_allclose(np.asarray(out1), np.asarray(ref1),
                               rtol=1e-5, atol=1e-5)

    # bf16 input: streamed in bf16, output dtype preserved (like the PyTorch module).
    x_bf16 = semantic_vec.astype(jnp.bfloat16)
    out_b = jax.block_until_ready(
        scale_module(x_bf16, field_center, scale2, bias2))
    assert out_b.dtype == jnp.bfloat16
    ref_b = scale_module_ref(x_bf16.astype(jnp.float32), field_center,
                             scale2, bias2)
    np.testing.assert_allclose(np.asarray(out_b, dtype=np.float32),
                               np.asarray(ref_b), rtol=5e-2, atol=5e-2)

    print("KERNEL_OK")
</pallas_src>

<mosaic_0001>
module attributes {stable_mosaic.version = 11 : i64} {
  func.func @scale_module_kernel(%arg0: i32, %arg1: i32, %arg2: memref<2x128xf32, #tpu.memory_space<vmem>>, %arg3: memref<1x128xf32, #tpu.memory_space<vmem>>, %arg4: memref<1x128xf32, #tpu.memory_space<vmem>>, %arg5: memref<2x128xf32, #tpu.memory_space<vmem>>) attributes {dimension_semantics = [#tpu.dimension_semantics<parallel>, #tpu.dimension_semantics<parallel>], iteration_bounds = array<i64: 1, 1>, scalar_prefetch = 0 : i64, scratch_operands = 0 : i64, tpu.core_type = #tpu.core_type<tc>, window_params = [{transform_indices = @transform_0, window_bounds = array<i64: 2, 128>}, {transform_indices = @transform_1, window_bounds = array<i64: 1, 128>}, {transform_indices = @transform_2, window_bounds = array<i64: 1, 128>}, {transform_indices = @transform_3, window_bounds = array<i64: 2, 128>}]} {
    %c0 = arith.constant 0 : index
    %c0_0 = arith.constant 0 : index
    %0 = vector.load %arg2[%c0, %c0_0] : memref<2x128xf32, #tpu.memory_space<vmem>>, vector<2x128xf32>
    %c0_1 = arith.constant 0 : index
    %c0_2 = arith.constant 0 : index
    %1 = vector.load %arg3[%c0_1, %c0_2] : memref<1x128xf32, #tpu.memory_space<vmem>>, vector<1x128xf32>
    %2 = vector.broadcast %1 : vector<1x128xf32> to vector<2x128xf32>
    %3 = arith.mulf %0, %2 : vector<2x128xf32>
    %c0_3 = arith.constant 0 : index
    %c0_4 = arith.constant 0 : index
    %4 = vector.load %arg4[%c0_3, %c0_4] : memref<1x128xf32, #tpu.memory_space<vmem>>, vector<1x128xf32>
    %5 = vector.broadcast %4 : vector<1x128xf32> to vector<2x128xf32>
    %6 = arith.addf %3, %5 : vector<2x128xf32>
    %cst = arith.constant 1.000000e-01 : f32
    %7 = vector.broadcast %cst : f32 to vector<2x128xf32>
    %8 = arith.mulf %7, %6 : vector<2x128xf32>
    %9 = arith.maximumf %6, %8 : vector<2x128xf32>
    %c0_5 = arith.constant 0 : index
    %c0_6 = arith.constant 0 : index
    %10 = vector.load %arg5[%c0_5, %c0_6] : memref<2x128xf32, #tpu.memory_space<vmem>>, vector<2x128xf32>
    tpu.vector_store %arg5[%c0_5, %c0_6], %9 {strides = array<i32>} : memref<2x128xf32, #tpu.memory_space<vmem>>, vector<2x128xf32>,
    return
  }
  func.func @transform_0(%arg0: i32, %arg1: i32) -> (i32, i32) {
    %c0_i32 = arith.constant 0 : i32
    return %arg0, %arg1 : i32, i32
  }
  func.func @transform_1(%arg0: i32, %arg1: i32) -> (i32, i32) {
    %c0_i32 = arith.constant 0 : i32
    %c0_i32_0 = arith.constant 0 : i32
    return %c0_i32, %arg1 : i32, i32
  }
  func.func @transform_2(%arg0: i32, %arg1: i32) -> (i32, i32) {
    %c0_i32 = arith.constant 0 : i32
    %c0_i32_0 = arith.constant 0 : i32
    return %c0_i32, %arg1 : i32, i32
  }
  func.func @transform_3(%arg0: i32, %arg1: i32) -> (i32, i32) {
    %c0_i32 = arith.constant 0 : i32
    return %arg0, %arg1 : i32, i32
  }
}

</mosaic_0001>

<bundles_post_ra>
// kernel: tpu_custom_call.1
= control target key start
LH: loop header
LB: loop body
LE: loop exit
PB: predicated region body
PF: predicated region fallthrough
CT: control target
= control target key end

     0   :  { %8 = vsyncpa [#allocation3], 0  ;;  %s166_s0 = inlined_call_operand.hbm [shape: f32[2,128], index: 0, kind: input, shape index: {}]   ;;  %s167_s1 = inlined_call_operand.vmem [shape: f32[1,128], index: 1, kind: input, shape index: {}]   ;;  %s168_s2 = inlined_call_operand.vmem [shape: f32[1,128], index: 2, kind: input, shape index: {}]   ;;  %s169_s3 = inlined_call_operand.hbm [shape: f32[2,128], index: 3, kind: output, shape index: {}]  }
   0x1   :  { %9 = vsyncpa [#allocation4], 0  ;;  %s114_s12 = smov [#allocation2]   ;;  %s66_s16 = scalar_lea.hbm %s166_s0, 32 }
   0x2   :  { %s16_s13 = sshll.u32 %s114_s12, 4  ;;  %p67_p0 = scmp.ne.s32.totalorder %s166_s0, %s66_s16  ;;  %s17_s13 = int_to_ptr.vmem [resolvable:$true] %s16_s13 }
   0x3   :  { %p70_p1 = scmp.lt.u32.totalorder %s66_s16, %s166_s0 }
   0x5   :  { %p72_p2 = pnand %p70_p1, %p67_p0 }
   0x7   :  { %75 = shalt.err (!%p72_p2)
}
   0x8   :  { %s76_s21 = scalar_lea.vmem %s17_s13, 32  ;;  %p81_p4 = scmp.lt.s32.totalorder %s17_s13, %s17_s13 }
   0x9   :  { %p77_p3 = scmp.ne.s32.totalorder %s17_s13, %s76_s21  ;;  %p82_p5 = scmp.lt.s32.totalorder %s76_s21, %s76_s21 }
   0xb   :  { %p83_p6 = por %p82_p5, %p81_p4 }
   0xd   :  { %p84_p7 = pnand %p83_p6, %p77_p3 }
   0xf   :  { %87 = shalt.err (!%p84_p7)
}
  0x10   :  { %19 = dma.hbm_to_vmem [thread:$0]  %s166_s0, 32, %s17_s13, [#allocation3]  }
  0x11   :  { %110 = dma.done.wait [#allocation3], 32  }
  0x12   :  { %111 = vsyncadd [#allocation3], 4294967264  ;;  %v27_v0 = vld [vmem:[#allocation2] sm:$0x3]  ;;  %s115_s28 = smov [#allocation5]  }
  0x13   :  { %v62_v1 = vld [vmem:[%s167_s1] ss:$0 sm:$0xff]  ;;  %s53_s29 = sshll.u32 %s115_s28, 4  ;;  %s54_s29 = int_to_ptr.vmem [resolvable:$true] %s53_s29 }
  0x14   :  { %v63_v2 = vld [vmem:[%s168_s2] ss:$0 sm:$0xff]  ;;  %v35_v3 = vmul.f32 %v62_v1, %v27_v0  ;;  %s88_s0 = scalar_lea.vmem %s54_s29, 32  ;;  %p93_p9 = scmp.lt.s32.totalorder %s54_s29, %s54_s29 }
  0x15   :  { %p89_p8 = scmp.ne.s32.totalorder %s54_s29, %s88_s0  ;;  %p94_p10 = scmp.lt.s32.totalorder %s88_s0, %s88_s0 }
  0x16   :  { %v43_v4 = vadd.f32 %v63_v2, %v35_v3 }
  0x17   :  { %p95_p11 = por %p94_p10, %p93_p9 }
  0x18   :  { %v44_v5 = vmul.f32 0.1, %v43_v4 }
  0x19   :  { %p96_p12 = pnand %p95_p11, %p89_p8 }
  0x1a   :  { %v45_v6 = vmax.f32 %v43_v4, %v44_v5 }
  0x1c   :  { %46 = vst [vmem:[#allocation5] sm:$0x3] %v45_v6 }
  0x1d   :  { %99 = shalt.err (!%p96_p12)
}
  0x1e   :  { %s100_s4 = scalar_lea.hbm %s169_s3, 32 }
  0x1f   :  { %p101_p13 = scmp.ne.s32.totalorder %s169_s3, %s100_s4  ;;  %p104_p0 = scmp.lt.u32.totalorder %s100_s4, %s169_s3 }
  0x21   :  { %p106_p1 = pnand %p104_p0, %p101_p13 }
  0x23   :  { %109 = shalt.err (!%p106_p1)
}
  0x24   :  { %56 = dma.vmem_to_hbm [thread:$0]  %s54_s29, 32, %s169_s3, [#allocation4]  }
  0x25   :  { %112 = dma.done.wait [#allocation4], 32  }
  0x26   :  { %113 = vsyncadd [#allocation4], 4294967264 }
  0x27   :  { %60 = vsyncpa [#allocation3], 1 }
  0x28   :  { %61 = vsyncpa [#allocation4], 1 }

</bundles_post_ra>
